<compile_context>
chip_gen: v7x
topology: tpu7x:2x2x1
jax: 0.10.0
libtpu: 0.0.40
codegen_flags: <defaults>
</compile_context>

<pallas_src>
import functools

import jax
import jax.numpy as jnp
from jax import lax
from jax.experimental import pallas as pl
from jax.experimental.pallas import tpu as pltpu


# ----------------------------------------------------------------------------
# Pallas kernel: the WHOLE (multi-layer, (bi)directional) LSTM stack in one
# call.  Both directions of a layer are fused into one recurrence (block-
# diagonal W_hh), so each serial step is a single bf16 MXU matmul.
# ----------------------------------------------------------------------------
def lstm_stack_kernel(*refs, T, B, H, D, L):
    """Fused L-layer (bi)directional LSTM.

    refs, in (inputs, outputs, scratch) order:
      gx0_ref      : (T, B, 4*D*H) f32   layer-0 gate inputs; bias folded in,
                                         backward columns already time-reversed
      whh_ref      : (L, D*H, 4*D*H) bf16  block-diagonal recurrent weights
      [wih_rest_ref: (L-1, D*H, 4*D*H) bf16]   (only if L > 1)
      [b_rest_ref  : (L-1, 1, 4*D*H)  f32  ]   (only if L > 1)
      hfin_ref     : (B, D*H) f32        final hidden [h_fwd | h_bwd]
      [hseq_sc     : (T*B, D*H) f32 VMEM scratch]  (only if L > 1)

    Gate column layout (width 4*D*H): blocks [i, f, o, g], each D*H wide;
    within each block the D directions are contiguous H-wide chunks.
    """
    DH = D * H
    G = 4 * DH
    if L == 1:
        gx0_ref, whh_ref, hfin_ref = refs
        wih_rest_ref = b_rest_ref = hseq_sc = None
    else:
        gx0_ref, whh_ref, wih_rest_ref, b_rest_ref, hfin_ref, hseq_sc = refs

    # Mask is only needed to time-reverse the backward-direction columns of
    # the in-kernel projections (layers >= 1); layer 0 arrives pre-merged.
    if D == 2 and L > 1:
        col = lax.broadcasted_iota(jnp.int32, (B, G), 1)
        fwd_mask = (col % DH) < H
    else:
        fwd_mask = None

    def store_hseq(t, h):
        # Store in *position* order (torch layer output order) so the next
        # layer reads [h_fwd(pos) | h_bwd(pos)] rows directly.
        if D == 1:
            hseq_sc[t * B:(t + 1) * B, :] = h
        else:
            hseq_sc[t * B:(t + 1) * B, :H] = h[:, :H]
            hseq_sc[(T - 1 - t) * B:(T - t) * B, H:] = h[:, H:]

    def recur(get_gx, whh_bf, store):
        # Serial recurrence: h/c live in vregs; one bf16 MXU matmul per step;
        # bias, input projection and time reversal are all pre-folded into gx.
        h = jnp.zeros((B, DH), jnp.float32)
        c = jnp.zeros((B, DH), jnp.float32)
        # TODO(synk): for large T switch to lax.fori_loop(..., unroll=4..8);
        # full static unroll is only appropriate for small, known T.
        for t in range(T):
            gx = get_gx(t)
            if t == 0:
                gates = gx                      # h0 == 0  =>  h @ W_hh == 0
            else:
                gates = jnp.dot(h.astype(jnp.bfloat16), whh_bf,
                                preferred_element_type=jnp.float32) + gx
            # Gate blocks ordered [i, f, o, g]: one contiguous sigmoid region
            # of width 3*DH and one tanh region of width DH.
            ifo = jax.nn.sigmoid(gates[:, :3 * DH])
            g_g = jnp.tanh(gates[:, 3 * DH:])
            c = ifo[:, DH:2 * DH] * c + ifo[:, :DH] * g_g
            h = ifo[:, 2 * DH:3 * DH] * jnp.tanh(c)
            if store is not None:
                store(t, h)
        return h

    # ---- layer 0: gate inputs fully precomputed (gathered projected table) --
    h = recur(lambda t: gx0_ref[t],
              whh_ref[0],
              store_hseq if L > 1 else None)

    # ---- layers 1 .. L-1 (input projection hoisted out of each recurrence) --
    for layer in range(1, L):
        x_prev = hseq_sc[...].astype(jnp.bfloat16)              # (T*B, DH)
        xp = jnp.dot(x_prev, wih_rest_ref[layer - 1],
                     preferred_element_type=jnp.float32) + b_rest_ref[layer - 1]
        if D == 1:
            get_gx = lambda t, xp=xp: xp[t * B:(t + 1) * B, :]
        else:
            get_gx = lambda t, xp=xp: jnp.where(
                fwd_mask,
                xp[t * B:(t + 1) * B, :],
                xp[(T - 1 - t) * B:(T - t) * B, :])
        h = recur(get_gx, whh_ref[layer],
                  store_hseq if (layer + 1 < L) else None)

    # [h_fwd_final | h_bwd_final] == torch.cat((hidden[-2], hidden[-1]), dim=1)
    hfin_ref[...] = h


def run_lstm_stack(gx0, arrays, *, T, Bp, H, D, L):
    DH = D * H
    args = [gx0, arrays["whh_stack"]]
    scratch = []
    if L > 1:
        args += [arrays["wih_rest"], arrays["b_rest"]]
        scratch = [pltpu.VMEM((T * Bp, DH), jnp.float32)]
    return pl.pallas_call(
        functools.partial(lstm_stack_kernel, T=T, B=Bp, H=H, D=D, L=L),
        out_shape=jax.ShapeDtypeStruct((Bp, DH), jnp.float32),
        in_specs=[pl.BlockSpec(memory_space=pltpu.MemorySpace.VMEM)] * len(args),
        out_specs=pl.BlockSpec(memory_space=pltpu.MemorySpace.VMEM),
        scratch_shapes=scratch,
    )(*args)


# ----------------------------------------------------------------------------
# One-time weight stacking: PyTorch (4H, in)/(4H, H) weights, gate order
# [i, f, g, o]  ->  transposed, reordered to [i, f, o, g], directions
# interleaved per gate block, W_hh block-diagonal; layer-0 projection folded
# into the embedding table.
# ----------------------------------------------------------------------------
def _reorder_ifog(w, H):
    """Last-dim 4H in torch order [i, f, g, o] -> [i, f, o, g]."""
    return jnp.concatenate(
        [w[..., 0 * H:1 * H], w[..., 1 * H:2 * H],
         w[..., 3 * H:4 * H], w[..., 2 * H:3 * H]], axis=-1)


def stack_layer_weights(dirs, H):
    """dirs: list over directions of (w_ih (4H,in), w_hh (4H,H), b_ih, b_hh)."""
    D = len(dirs)
    DH = D * H
    wih_r = [_reorder_ifog(w_ih.T, H) for (w_ih, _, _, _) in dirs]   # (in, 4H)
    whh_r = [_reorder_ifog(w_hh.T, H) for (_, w_hh, _, _) in dirs]   # (H, 4H)
    b_r = [_reorder_ifog((b_ih + b_hh)[None, :], H)
           for (_, _, b_ih, b_hh) in dirs]                           # (1, 4H)

    # Column layout: [i(dir0..dirD-1), f(...), o(...), g(...)], each chunk H.
    wih_all = jnp.concatenate(
        [wih_r[d][:, q * H:(q + 1) * H] for q in range(4) for d in range(D)],
        axis=1).astype(jnp.float32)                                  # (in, 4DH)
    b_all = jnp.concatenate(
        [b_r[d][:, q * H:(q + 1) * H] for q in range(4) for d in range(D)],
        axis=1).astype(jnp.float32)                                  # (1, 4DH)

    whh_all = jnp.zeros((DH, 4 * DH), jnp.float32)
    for q in range(4):
        for d in range(D):
            whh_all = whh_all.at[
                d * H:(d + 1) * H,
                (q * D + d) * H:(q * D + d + 1) * H,
            ].set(whh_r[d][:, q * H:(q + 1) * H])
    return wih_all, whh_all, b_all


def prepare_arrays(embedding, layers, H):
    """Build the runtime arrays consumed by the fused kernel."""
    L = len(layers)
    stacks = [stack_layer_weights(dirs, H) for dirs in layers]
    wih0, _, b0 = stacks[0]
    # Layer-0 projection folded into the embedding table (bias included);
    # computed in f32 once per weight set.
    proj0 = embedding.astype(jnp.float32) @ wih0 + b0                # (V, 4DH)
    arrays = {
        "proj0": proj0,
        "whh_stack": jnp.stack([s[1] for s in stacks]).astype(jnp.bfloat16),
    }
    if L > 1:
        arrays["wih_rest"] = jnp.stack(
            [s[0] for s in stacks[1:]]).astype(jnp.bfloat16)         # (L-1,DH,4DH)
        arrays["b_rest"] = jnp.stack([s[2] for s in stacks[1:]])     # (L-1,1,4DH)
    return arrays


# ----------------------------------------------------------------------------
# Module forward: tiny XLA glue (table gather, reversal merge, batch pad,
# time-major transpose) + ONE pallas_call for the full LSTM stack.
# ----------------------------------------------------------------------------
def lstm_module_forward(x_ids, arrays, *, latent_dim, num_layers, bidirectional):
    H = latent_dim
    D = 2 if bidirectional else 1
    L = num_layers
    DH = D * H
    G = 4 * DH
    B, T = x_ids.shape
    Bp = ((B + 7) // 8) * 8          # pad batch to a full sublane group

    # Embedding lookup + layer-0 input projection + bias == one table gather.
    xp0 = jnp.take(arrays["proj0"], x_ids, axis=0)                   # (B, T, G)
    if D == 2:
        # Backward-direction columns read position T-1-t: fold the time
        # reversal in here, once, so the kernel's serial loop has no selects.
        col = jnp.arange(G)
        fwd_mask = (col % DH) < H
        xp0 = jnp.where(fwd_mask[None, None, :], xp0, xp0[:, ::-1, :])
    if Bp != B:
        xp0 = jnp.pad(xp0, ((0, Bp - B), (0, 0), (0, 0)))
    gx0 = jnp.transpose(xp0, (1, 0, 2)).astype(jnp.float32)          # (T, Bp, G)

    hfin = run_lstm_stack(gx0, arrays, T=T, Bp=Bp, H=H, D=D, L=L)
    return hfin[:B]


# ----------------------------------------------------------------------------
# Pure-JAX f32 reference (independent path, raw per-direction weights).
# ----------------------------------------------------------------------------
def ref_lstm_direction(seq_tm, w_ih, w_hh, bias):
    T, B, _ = seq_tm.shape
    H = w_hh.shape[1]
    h = jnp.zeros((B, H), jnp.float32)
    c = jnp.zeros((B, H), jnp.float32)
    hs = []
    for t in range(T):
        gates = seq_tm[t] @ w_ih.T + h @ w_hh.T + bias
        i_g = jax.nn.sigmoid(gates[:, 0 * H:1 * H])
        f_g = jax.nn.sigmoid(gates[:, 1 * H:2 * H])
        g_g = jnp.tanh(gates[:, 2 * H:3 * H])
        o_g = jax.nn.sigmoid(gates[:, 3 * H:4 * H])
        c = f_g * c + i_g * g_g
        h = o_g * jnp.tanh(c)
        hs.append(h)
    return jnp.stack(hs, axis=0), h


def ref_module_forward(x_ids, params):
    emb = jnp.take(params["embedding"], x_ids, axis=0)
    seq = jnp.transpose(emb, (1, 0, 2)).astype(jnp.float32)
    num_dirs = 2 if params["bidirectional"] else 1
    layer_input = seq
    last_finals = None
    for layer in range(params["num_layers"]):
        dir_seqs, dir_finals = [], []
        for d in range(num_dirs):
            w_ih, w_hh, b_ih, b_hh = params["layers"][layer][d]
            inp = layer_input if d == 0 else layer_input[::-1]
            hseq, hfin = ref_lstm_direction(inp, w_ih, w_hh, b_ih + b_hh)
            if d == 1:
                hseq = hseq[::-1]
            dir_seqs.append(hseq)
            dir_finals.append(hfin)
        layer_input = jnp.concatenate(dir_seqs, axis=-1)
        last_finals = dir_finals
    if params["bidirectional"]:
        return jnp.concatenate(last_finals, axis=1)
    return last_finals[0]


# ----------------------------------------------------------------------------
# Deterministic parameter construction (synthetic, matches nn.LSTM shapes).
# ----------------------------------------------------------------------------
def make_params(key, vocab_size, embedding_dim, latent_dim, num_layers,
                bidirectional, pad_idx=0):
    num_dirs = 2 if bidirectional else 1
    k_emb, key = jax.random.split(key)
    emb = jax.random.normal(k_emb, (vocab_size, embedding_dim), jnp.float32)
    emb = emb.at[pad_idx].set(0.0)  # nn.Embedding(padding_idx=...) zero row

    scale = 1.0 / jnp.sqrt(latent_dim)
    layers = []
    for layer in range(num_layers):
        in_dim = embedding_dim if layer == 0 else latent_dim * num_dirs
        dirs = []
        for _ in range(num_dirs):
            key, k1, k2, k3, k4 = jax.random.split(key, 5)
            w_ih = jax.random.uniform(k1, (4 * latent_dim, in_dim),
                                      jnp.float32, -scale, scale)
            w_hh = jax.random.uniform(k2, (4 * latent_dim, latent_dim),
                                      jnp.float32, -scale, scale)
            b_ih = jax.random.uniform(k3, (4 * latent_dim,),
                                      jnp.float32, -scale, scale)
            b_hh = jax.random.uniform(k4, (4 * latent_dim,),
                                      jnp.float32, -scale, scale)
            dirs.append((w_ih, w_hh, b_ih, b_hh))
        layers.append(dirs)

    return {
        "embedding": emb,
        "layers": layers,
        "arrays": prepare_arrays(emb, layers, latent_dim),
        "num_layers": num_layers,
        "bidirectional": bidirectional,
        "latent_dim": latent_dim,
    }


if __name__ == "__main__":
    # config: embedding_dim=16, latent_dim=32, lstm_layers=1, bidirectional=True
    VOCAB = 20
    EMB_DIM = 16
    LATENT = 32
    B, T = 2, 8

    key = jax.random.PRNGKey(0)
    k_params, k_ids, k_params_b = jax.random.split(key, 3)

    # token ids, including some <pad> (=0) tokens
    x_ids = jax.random.randint(k_ids, (B, T), 0, VOCAB, dtype=jnp.int32)

    # bf16 MXU operands -> loosened tolerance vs. the f32 reference
    ATOL = RTOL = 4e-2

    # ---- Config A: bidirectional, 1 layer (the module's config) ------------
    params = make_params(k_params, VOCAB, EMB_DIM, LATENT,
                         num_layers=1, bidirectional=True)
    fwd_a = jax.jit(functools.partial(
        lstm_module_forward, latent_dim=LATENT, num_layers=1,
        bidirectional=True))
    out = jax.block_until_ready(fwd_a(x_ids, params["arrays"]))
    assert out.shape == (B, 2 * LATENT), out.shape
    ref = ref_module_forward(x_ids, params)
    err = float(jnp.max(jnp.abs(out - ref)))
    assert jnp.allclose(out, ref, atol=ATOL, rtol=RTOL), (
        f"bidir mismatch vs reference: max abs err {err}")

    # ---- Config B: unidirectional, 2 layers (exercises D=1 + fused stack) --
    params_b = make_params(k_params_b, VOCAB, EMB_DIM, LATENT,
                           num_layers=2, bidirectional=False)
    fwd_b = jax.jit(functools.partial(
        lstm_module_forward, latent_dim=LATENT, num_layers=2,
        bidirectional=False))
    out_b = jax.block_until_ready(fwd_b(x_ids, params_b["arrays"]))
    assert out_b.shape == (B, LATENT), out_b.shape
    ref_b = ref_module_forward(x_ids, params_b)
    err_b = float(jnp.max(jnp.abs(out_b - ref_b)))
    assert jnp.allclose(out_b, ref_b, atol=ATOL, rtol=RTOL), (
        f"unidir mismatch vs reference: max abs err {err_b}")

    print("KERNEL_OK")
</pallas_src>

<mosaic_0001>
module attributes {stable_mosaic.version = 11 : i64} {
  func.func @lstm_stack_kernel(%arg0: memref<8x8x256xf32, #tpu.memory_space<vmem>>, %arg1: memref<1x64x256xbf16, #tpu.memory_space<vmem>>, %arg2: memref<8x64xf32, #tpu.memory_space<vmem>>) attributes {dimension_semantics = [], scalar_prefetch = 0 : i64, scratch_operands = 0 : i64, tpu.core_type = #tpu.core_type<tc>} {
    %c0 = arith.constant 0 : index
    %c0_0 = arith.constant 0 : index
    %c0_1 = arith.constant 0 : index
    %0 = vector.load %arg1[%c0, %c0_0, %c0_1] : memref<1x64x256xbf16, #tpu.memory_space<vmem>>, vector<1x64x256xbf16>
    %1 = vector.shape_cast %0 : vector<1x64x256xbf16> to vector<64x256xbf16>
    %cst = arith.constant 0.000000e+00 : f32
    %2 = vector.broadcast %cst : f32 to vector<8x64xf32>
    %c0_2 = arith.constant 0 : index
    %c0_3 = arith.constant 0 : index
    %c0_4 = arith.constant 0 : index
    %3 = vector.load %arg0[%c0_2, %c0_3, %c0_4] : memref<8x8x256xf32, #tpu.memory_space<vmem>>, vector<1x8x256xf32>
    %4 = vector.shape_cast %3 : vector<1x8x256xf32> to vector<8x256xf32>
    %5 = vector.extract_strided_slice %4 {offsets = [0, 0], sizes = [8, 192], strides = [1, 1]} : vector<8x256xf32> to vector<8x192xf32>
    %6 = arith.negf %5 : vector<8x192xf32>
    %7 = math.exp %6 : vector<8x192xf32>
    %cst_5 = arith.constant 1.000000e+00 : f32
    %8 = vector.broadcast %cst_5 : f32 to vector<8x192xf32>
    %9 = arith.addf %8, %7 : vector<8x192xf32>
    %10 = arith.divf %8, %9 : vector<8x192xf32>
    %11 = vector.extract_strided_slice %4 {offsets = [0, 192], sizes = [8, 64], strides = [1, 1]} : vector<8x256xf32> to vector<8x64xf32>
    %12 = math.tanh %11 : vector<8x64xf32>
    %13 = vector.extract_strided_slice %10 {offsets = [0, 64], sizes = [8, 64], strides = [1, 1]} : vector<8x192xf32> to vector<8x64xf32>
    %14 = arith.mulf %13, %2 : vector<8x64xf32>
    %15 = vector.extract_strided_slice %10 {offsets = [0, 0], sizes = [8, 64], strides = [1, 1]} : vector<8x192xf32> to vector<8x64xf32>
    %16 = arith.mulf %15, %12 : vector<8x64xf32>
    %17 = arith.addf %14, %16 : vector<8x64xf32>
    %18 = vector.extract_strided_slice %10 {offsets = [0, 128], sizes = [8, 64], strides = [1, 1]} : vector<8x192xf32> to vector<8x64xf32>
    %19 = math.tanh %17 : vector<8x64xf32>
    %20 = arith.mulf %18, %19 : vector<8x64xf32>
    %c1 = arith.constant 1 : index
    %c0_6 = arith.constant 0 : index
    %c0_7 = arith.constant 0 : index
    %21 = vector.load %arg0[%c1, %c0_6, %c0_7] : memref<8x8x256xf32, #tpu.memory_space<vmem>>, vector<1x8x256xf32>
    %22 = vector.shape_cast %21 : vector<1x8x256xf32> to vector<8x256xf32>
    %23 = arith.truncf %20 : vector<8x64xf32> to vector<8x64xbf16>
    %cst_8 = arith.constant dense<0.000000e+00> : vector<8x256xf32>
    %24 = tpu.matmul %23, %1, %cst_8 {dimension_numbers = #tpu.dot_dimension_numbers<[1], [0], [0], [1], [0, 0, 1, 1], [], []>} : vector<8x64xbf16>, vector<64x256xbf16>, vector<8x256xf32> -> vector<8x256xf32>
    %25 = arith.addf %24, %22 : vector<8x256xf32>
    %26 = vector.extract_strided_slice %25 {offsets = [0, 0], sizes = [8, 192], strides = [1, 1]} : vector<8x256xf32> to vector<8x192xf32>
    %27 = arith.negf %26 : vector<8x192xf32>
    %28 = math.exp %27 : vector<8x192xf32>
    %cst_9 = arith.constant 1.000000e+00 : f32
    %29 = vector.broadcast %cst_9 : f32 to vector<8x192xf32>
    %30 = arith.addf %29, %28 : vector<8x192xf32>
    %31 = arith.divf %29, %30 : vector<8x192xf32>
    %32 = vector.extract_strided_slice %25 {offsets = [0, 192], sizes = [8, 64], strides = [1, 1]} : vector<8x256xf32> to vector<8x64xf32>
    %33 = math.tanh %32 : vector<8x64xf32>
    %34 = vector.extract_strided_slice %31 {offsets = [0, 64], sizes = [8, 64], strides = [1, 1]} : vector<8x192xf32> to vector<8x64xf32>
    %35 = arith.mulf %34, %17 : vector<8x64xf32>
    %36 = vector.extract_strided_slice %31 {offsets = [0, 0], sizes = [8, 64], strides = [1, 1]} : vector<8x192xf32> to vector<8x64xf32>
    %37 = arith.mulf %36, %33 : vector<8x64xf32>
    %38 = arith.addf %35, %37 : vector<8x64xf32>
    %39 = vector.extract_strided_slice %31 {offsets = [0, 128], sizes = [8, 64], strides = [1, 1]} : vector<8x192xf32> to vector<8x64xf32>
    %40 = math.tanh %38 : vector<8x64xf32>
    %41 = arith.mulf %39, %40 : vector<8x64xf32>
    %c2 = arith.constant 2 : index
    %c0_10 = arith.constant 0 : index
    %c0_11 = arith.constant 0 : index
    %42 = vector.load %arg0[%c2, %c0_10, %c0_11] : memref<8x8x256xf32, #tpu.memory_space<vmem>>, vector<1x8x256xf32>
    %43 = vector.shape_cast %42 : vector<1x8x256xf32> to vector<8x256xf32>
    %44 = arith.truncf %41 : vector<8x64xf32> to vector<8x64xbf16>
    %cst_12 = arith.constant dense<0.000000e+00> : vector<8x256xf32>
    %45 = tpu.matmul %44, %1, %cst_12 {dimension_numbers = #tpu.dot_dimension_numbers<[1], [0], [0], [1], [0, 0, 1, 1], [], []>} : vector<8x64xbf16>, vector<64x256xbf16>, vector<8x256xf32> -> vector<8x256xf32>
    %46 = arith.addf %45, %43 : vector<8x256xf32>
    %47 = vector.extract_strided_slice %46 {offsets = [0, 0], sizes = [8, 192], strides = [1, 1]} : vector<8x256xf32> to vector<8x192xf32>
    %48 = arith.negf %47 : vector<8x192xf32>
    %49 = math.exp %48 : vector<8x192xf32>
    %cst_13 = arith.constant 1.000000e+00 : f32
    %50 = vector.broadcast %cst_13 : f32 to vector<8x192xf32>
    %51 = arith.addf %50, %49 : vector<8x192xf32>
    %52 = arith.divf %50, %51 : vector<8x192xf32>
    %53 = vector.extract_strided_slice %46 {offsets = [0, 192], sizes = [8, 64], strides = [1, 1]} : vector<8x256xf32> to vector<8x64xf32>
    %54 = math.tanh %53 : vector<8x64xf32>
    %55 = vector.extract_strided_slice %52 {offsets = [0, 64], sizes = [8, 64], strides = [1, 1]} : vector<8x192xf32> to vector<8x64xf32>
    %56 = arith.mulf %55, %38 : vector<8x64xf32>
    %57 = vector.extract_strided_slice %52 {offsets = [0, 0], sizes = [8, 64], strides = [1, 1]} : vector<8x192xf32> to vector<8x64xf32>
    %58 = arith.mulf %57, %54 : vector<8x64xf32>
    %59 = arith.addf %56, %58 : vector<8x64xf32>
    %60 = vector.extract_strided_slice %52 {offsets = [0, 128], sizes = [8, 64], strides = [1, 1]} : vector<8x192xf32> to vector<8x64xf32>
    %61 = math.tanh %59 : vector<8x64xf32>
    %62 = arith.mulf %60, %61 : vector<8x64xf32>
    %c3 = arith.constant 3 : index
    %c0_14 = arith.constant 0 : index
    %c0_15 = arith.constant 0 : index
    %63 = vector.load %arg0[%c3, %c0_14, %c0_15] : memref<8x8x256xf32, #tpu.memory_space<vmem>>, vector<1x8x256xf32>
    %64 = vector.shape_cast %63 : vector<1x8x256xf32> to vector<8x256xf32>
    %65 = arith.truncf %62 : vector<8x64xf32> to vector<8x64xbf16>
    %cst_16 = arith.constant dense<0.000000e+00> : vector<8x256xf32>
    %66 = tpu.matmul %65, %1, %cst_16 {dimension_numbers = #tpu.dot_dimension_numbers<[1], [0], [0], [1], [0, 0, 1, 1], [], []>} : vector<8x64xbf16>, vector<64x256xbf16>, vector<8x256xf32> -> vector<8x256xf32>
    %67 = arith.addf %66, %64 : vector<8x256xf32>
    %68 = vector.extract_strided_slice %67 {offsets = [0, 0], sizes = [8, 192], strides = [1, 1]} : vector<8x256xf32> to vector<8x192xf32>
    %69 = arith.negf %68 : vector<8x192xf32>
    %70 = math.exp %69 : vector<8x192xf32>
    %cst_17 = arith.constant 1.000000e+00 : f32
    %71 = vector.broadcast %cst_17 : f32 to vector<8x192xf32>
    %72 = arith.addf %71, %70 : vector<8x192xf32>
    %73 = arith.divf %71, %72 : vector<8x192xf32>
    %74 = vector.extract_strided_slice %67 {offsets = [0, 192], sizes = [8, 64], strides = [1, 1]} : vector<8x256xf32> to vector<8x64xf32>
    %75 = math.tanh %74 : vector<8x64xf32>
    %76 = vector.extract_strided_slice %73 {offsets = [0, 64], sizes = [8, 64], strides = [1, 1]} : vector<8x192xf32> to vector<8x64xf32>
    %77 = arith.mulf %76, %59 : vector<8x64xf32>
    %78 = vector.extract_strided_slice %73 {offsets = [0, 0], sizes = [8, 64], strides = [1, 1]} : vector<8x192xf32> to vector<8x64xf32>
    %79 = arith.mulf %78, %75 : vector<8x64xf32>
    %80 = arith.addf %77, %79 : vector<8x64xf32>
    %81 = vector.extract_strided_slice %73 {offsets = [0, 128], sizes = [8, 64], strides = [1, 1]} : vector<8x192xf32> to vector<8x64xf32>
    %82 = math.tanh %80 : vector<8x64xf32>
    %83 = arith.mulf %81, %82 : vector<8x64xf32>
    %c4 = arith.constant 4 : index
    %c0_18 = arith.constant 0 : index
    %c0_19 = arith.constant 0 : index
    %84 = vector.load %arg0[%c4, %c0_18, %c0_19] : memref<8x8x256xf32, #tpu.memory_space<vmem>>, vector<1x8x256xf32>
    %85 = vector.shape_cast %84 : vector<1x8x256xf32> to vector<8x256xf32>
    %86 = arith.truncf %83 : vector<8x64xf32> to vector<8x64xbf16>
    %cst_20 = arith.constant dense<0.000000e+00> : vector<8x256xf32>
    %87 = tpu.matmul %86, %1, %cst_20 {dimension_numbers = #tpu.dot_dimension_numbers<[1], [0], [0], [1], [0, 0, 1, 1], [], []>} : vector<8x64xbf16>, vector<64x256xbf16>, vector<8x256xf32> -> vector<8x256xf32>
    %88 = arith.addf %87, %85 : vector<8x256xf32>
    %89 = vector.extract_strided_slice %88 {offsets = [0, 0], sizes = [8, 192], strides = [1, 1]} : vector<8x256xf32> to vector<8x192xf32>
    %90 = arith.negf %89 : vector<8x192xf32>
    %91 = math.exp %90 : vector<8x192xf32>
    %cst_21 = arith.constant 1.000000e+00 : f32
    %92 = vector.broadcast %cst_21 : f32 to vector<8x192xf32>
    %93 = arith.addf %92, %91 : vector<8x192xf32>
    %94 = arith.divf %92, %93 : vector<8x192xf32>
    %95 = vector.extract_strided_slice %88 {offsets = [0, 192], sizes = [8, 64], strides = [1, 1]} : vector<8x256xf32> to vector<8x64xf32>
    %96 = math.tanh %95 : vector<8x64xf32>
    %97 = vector.extract_strided_slice %94 {offsets = [0, 64], sizes = [8, 64], strides = [1, 1]} : vector<8x192xf32> to vector<8x64xf32>
    %98 = arith.mulf %97, %80 : vector<8x64xf32>
    %99 = vector.extract_strided_slice %94 {offsets = [0, 0], sizes = [8, 64], strides = [1, 1]} : vector<8x192xf32> to vector<8x64xf32>
    %100 = arith.mulf %99, %96 : vector<8x64xf32>
    %101 = arith.addf %98, %100 : vector<8x64xf32>
    %102 = vector.extract_strided_slice %94 {offsets = [0, 128], sizes = [8, 64], strides = [1, 1]} : vector<8x192xf32> to vector<8x64xf32>
    %103 = math.tanh %101 : vector<8x64xf32>
    %104 = arith.mulf %102, %103 : vector<8x64xf32>
    %c5 = arith.constant 5 : index
    %c0_22 = arith.constant 0 : index
    %c0_23 = arith.constant 0 : index
    %105 = vector.load %arg0[%c5, %c0_22, %c0_23] : memref<8x8x256xf32, #tpu.memory_space<vmem>>, vector<1x8x256xf32>
    %106 = vector.shape_cast %105 : vector<1x8x256xf32> to vector<8x256xf32>
    %107 = arith.truncf %104 : vector<8x64xf32> to vector<8x64xbf16>
    %cst_24 = arith.constant dense<0.000000e+00> : vector<8x256xf32>
    %108 = tpu.matmul %107, %1, %cst_24 {dimension_numbers = #tpu.dot_dimension_numbers<[1], [0], [0], [1], [0, 0, 1, 1], [], []>} : vector<8x64xbf16>, vector<64x256xbf16>, vector<8x256xf32> -> vector<8x256xf32>
    %109 = arith.addf %108, %106 : vector<8x256xf32>
    %110 = vector.extract_strided_slice %109 {offsets = [0, 0], sizes = [8, 192], strides = [1, 1]} : vector<8x256xf32> to vector<8x192xf32>
    %111 = arith.negf %110 : vector<8x192xf32>
    %112 = math.exp %111 : vector<8x192xf32>
    %cst_25 = arith.constant 1.000000e+00 : f32
    %113 = vector.broadcast %cst_25 : f32 to vector<8x192xf32>
    %114 = arith.addf %113, %112 : vector<8x192xf32>
    %115 = arith.divf %113, %114 : vector<8x192xf32>
    %116 = vector.extract_strided_slice %109 {offsets = [0, 192], sizes = [8, 64], strides = [1, 1]} : vector<8x256xf32> to vector<8x64xf32>
    %117 = math.tanh %116 : vector<8x64xf32>
    %118 = vector.extract_strided_slice %115 {offsets = [0, 64], sizes = [8, 64], strides = [1, 1]} : vector<8x192xf32> to vector<8x64xf32>
    %119 = arith.mulf %118, %101 : vector<8x64xf32>
    %120 = vector.extract_strided_slice %115 {offsets = [0, 0], sizes = [8, 64], strides = [1, 1]} : vector<8x192xf32> to vector<8x64xf32>
    %121 = arith.mulf %120, %117 : vector<8x64xf32>
    %122 = arith.addf %119, %121 : vector<8x64xf32>
    %123 = vector.extract_strided_slice %115 {offsets = [0, 128], sizes = [8, 64], strides = [1, 1]} : vector<8x192xf32> to vector<8x64xf32>
    %124 = math.tanh %122 : vector<8x64xf32>
    %125 = arith.mulf %123, %124 : vector<8x64xf32>
    %c6 = arith.constant 6 : index
    %c0_26 = arith.constant 0 : index
    %c0_27 = arith.constant 0 : index
    %126 = vector.load %arg0[%c6, %c0_26, %c0_27] : memref<8x8x256xf32, #tpu.memory_space<vmem>>, vector<1x8x256xf32>
    %127 = vector.shape_cast %126 : vector<1x8x256xf32> to vector<8x256xf32>
    %128 = arith.truncf %125 : vector<8x64xf32> to vector<8x64xbf16>
    %cst_28 = arith.constant dense<0.000000e+00> : vector<8x256xf32>
    %129 = tpu.matmul %128, %1, %cst_28 {dimension_numbers = #tpu.dot_dimension_numbers<[1], [0], [0], [1], [0, 0, 1, 1], [], []>} : vector<8x64xbf16>, vector<64x256xbf16>, vector<8x256xf32> -> vector<8x256xf32>
    %130 = arith.addf %129, %127 : vector<8x256xf32>
    %131 = vector.extract_strided_slice %130 {offsets = [0, 0], sizes = [8, 192], strides = [1, 1]} : vector<8x256xf32> to vector<8x192xf32>
    %132 = arith.negf %131 : vector<8x192xf32>
    %133 = math.exp %132 : vector<8x192xf32>
    %cst_29 = arith.constant 1.000000e+00 : f32
    %134 = vector.broadcast %cst_29 : f32 to vector<8x192xf32>
    %135 = arith.addf %134, %133 : vector<8x192xf32>
    %136 = arith.divf %134, %135 : vector<8x192xf32>
    %137 = vector.extract_strided_slice %130 {offsets = [0, 192], sizes = [8, 64], strides = [1, 1]} : vector<8x256xf32> to vector<8x64xf32>
    %138 = math.tanh %137 : vector<8x64xf32>
    %139 = vector.extract_strided_slice %136 {offsets = [0, 64], sizes = [8, 64], strides = [1, 1]} : vector<8x192xf32> to vector<8x64xf32>
    %140 = arith.mulf %139, %122 : vector<8x64xf32>
    %141 = vector.extract_strided_slice %136 {offsets = [0, 0], sizes = [8, 64], strides = [1, 1]} : vector<8x192xf32> to vector<8x64xf32>
    %142 = arith.mulf %141, %138 : vector<8x64xf32>
    %143 = arith.addf %140, %142 : vector<8x64xf32>
    %144 = vector.extract_strided_slice %136 {offsets = [0, 128], sizes = [8, 64], strides = [1, 1]} : vector<8x192xf32> to vector<8x64xf32>
    %145 = math.tanh %143 : vector<8x64xf32>
    %146 = arith.mulf %144, %145 : vector<8x64xf32>
    %c7 = arith.constant 7 : index
    %c0_30 = arith.constant 0 : index
    %c0_31 = arith.constant 0 : index
    %147 = vector.load %arg0[%c7, %c0_30, %c0_31] : memref<8x8x256xf32, #tpu.memory_space<vmem>>, vector<1x8x256xf32>
    %148 = vector.shape_cast %147 : vector<1x8x256xf32> to vector<8x256xf32>
    %149 = arith.truncf %146 : vector<8x64xf32> to vector<8x64xbf16>
    %cst_32 = arith.constant dense<0.000000e+00> : vector<8x256xf32>
    %150 = tpu.matmul %149, %1, %cst_32 {dimension_numbers = #tpu.dot_dimension_numbers<[1], [0], [0], [1], [0, 0, 1, 1], [], []>} : vector<8x64xbf16>, vector<64x256xbf16>, vector<8x256xf32> -> vector<8x256xf32>
    %151 = arith.addf %150, %148 : vector<8x256xf32>
    %152 = vector.extract_strided_slice %151 {offsets = [0, 0], sizes = [8, 192], strides = [1, 1]} : vector<8x256xf32> to vector<8x192xf32>
    %153 = arith.negf %152 : vector<8x192xf32>
    %154 = math.exp %153 : vector<8x192xf32>
    %cst_33 = arith.constant 1.000000e+00 : f32
    %155 = vector.broadcast %cst_33 : f32 to vector<8x192xf32>
    %156 = arith.addf %155, %154 : vector<8x192xf32>
    %157 = arith.divf %155, %156 : vector<8x192xf32>
    %158 = vector.extract_strided_slice %151 {offsets = [0, 192], sizes = [8, 64], strides = [1, 1]} : vector<8x256xf32> to vector<8x64xf32>
    %159 = math.tanh %158 : vector<8x64xf32>
    %160 = vector.extract_strided_slice %157 {offsets = [0, 64], sizes = [8, 64], strides = [1, 1]} : vector<8x192xf32> to vector<8x64xf32>
    %161 = arith.mulf %160, %143 : vector<8x64xf32>
    %162 = vector.extract_strided_slice %157 {offsets = [0, 0], sizes = [8, 64], strides = [1, 1]} : vector<8x192xf32> to vector<8x64xf32>
    %163 = arith.mulf %162, %159 : vector<8x64xf32>
    %164 = arith.addf %161, %163 : vector<8x64xf32>
    %165 = vector.extract_strided_slice %157 {offsets = [0, 128], sizes = [8, 64], strides = [1, 1]} : vector<8x192xf32> to vector<8x64xf32>
    %166 = math.tanh %164 : vector<8x64xf32>
    %167 = arith.mulf %165, %166 : vector<8x64xf32>
    %c0_34 = arith.constant 0 : index
    %c0_35 = arith.constant 0 : index
    %168 = vector.load %arg2[%c0_34, %c0_35] : memref<8x64xf32, #tpu.memory_space<vmem>>, vector<8x64xf32>
    tpu.vector_store %arg2[%c0_34, %c0_35], %167 {strides = array<i32>} : memref<8x64xf32, #tpu.memory_space<vmem>>, vector<8x64xf32>,
    return
  }
}

</mosaic_0001>

<bundles_post_ra>
// kernel: lstm_module_forward.1
= control target key start
LH: loop header
LB: loop body
LE: loop exit
PB: predicated region body
PF: predicated region fallthrough
CT: control target
= control target key end

     0   :  { %s799_s11 = smov 64   ;;  %v800_v20 = vmov 0   ;;  %vm96_vm0 = vcmask 523264   ;;  %s1002_s0 = inlined_call_operand.vmem [shape: f32[8,8,256], index: 0, kind: input, shape index: {}]   ;;  %s1003_s1 = inlined_call_operand.vmem [shape: bf16[1,64,256], index: 1, kind: input, shape index: {}]   ;;  %s1004_s2 = inlined_call_operand.vmem [shape: f32[8,64], index: 2, kind: output, shape index: {}]  }
   0x1   :  { %v21_v0 = vld [vmem:[%s1002_s0 + $0x8] sm:$0xff]  ;;  %v20_v2 = vld [vmem:[%s1002_s0] sm:$0xff]  ;;  %v838_v11 = vld [vmem:[%s1003_s1 + $0x14] ss:$8 sps:$4 sm:$0xff]   ;;  %132 = vmatprep.mubr.bf16.mxu0 %v800_v20  ;;  %210 = vmatprep.mubr.bf16.mxu1 %v800_v20 }
   0x2   :  { %703 = vtanh.f32 %v21_v0  ;;  %v644_v3 = vmul.f32 -1.442695, %v20_v2  ;;  %v827_v9 = vld [vmem:[%s1003_s1 + $0x4] ss:$8 sps:$4 sm:$0xff]   ;;  %v832_v10 = vld [vmem:[%s1003_s1] ss:$8 sps:$4 sm:$0xff]  }
   0x3   :  { %100 = vmatprep.subr.bf16.mxu0 %v827_v9  ;;  %178 = vmatprep.subr.bf16.mxu1 %v827_v9  ;;  %v845_v12 = vld [vmem:[%s1003_s1 + $0x10] ss:$8 sps:$4 sm:$0xff]   ;;  %v852_v13 = vld [vmem:[%s1003_s1 + $0x24] ss:$8 sps:$4 sm:$0xff]   ;;  %v859_v14 = vld [vmem:[%s1003_s1 + $0x20] ss:$8 sps:$4 sm:$0xff]  }
   0x4   :  { %705 = vpow2.f32 %v644_v3  ;;  %101 = vmatpush1.bf16.msra.mxu0 %v832_v10  ;;  %179 = vmatpush1.bf16.msra.mxu1 %v832_v10  ;;  %v869_v16 = vld [vmem:[%s1003_s1 + $0x34] ss:$8 sps:$4 sm:$0xff]   ;;  %v874_v18 = vld [vmem:[%s1003_s1 + $0x30] ss:$8 sps:$4 sm:$0xff]   ;;  %v645_v22 = vmul.f32 -1.442695, %v21_v0 }
   0x5   :  { %102 = vmatprep.subr.bf16.mxu0 %v838_v11  ;;  %180 = vmatprep.subr.bf16.mxu1 %v838_v11  ;;  %v647_v29 = vld [vmem:[%s1002_s0 + $0x18] sm:$0xff]  ;;  %v646_v36 = vld [vmem:[%s1002_s0 + $0x10] sm:$0xff]  ;;  %v660_v55 = vld [vmem:[%s1002_s0 + $0x28] sm:$0xff] }
   0x6   :  { %v659_v62 = vld [vmem:[%s1002_s0 + $0x20] sm:$0xff] }
   0x8   :  { %103 = vmatpush1.bf16.msra.mxu0 %v845_v12  ;;  %181 = vmatpush1.bf16.msra.mxu1 %v845_v12 }
   0x9   :  { %104 = vmatprep.subr.bf16.mxu0 %v852_v13  ;;  %182 = vmatprep.subr.bf16.mxu1 %v852_v13 }
   0xc   :  { %v704_v1 = vpop.eup %703  ;;  %105 = vmatpush1.bf16.msra.mxu0 %v859_v14  ;;  %183 = vmatpush1.bf16.msra.mxu1 %v859_v14 }
   0xd   :  { %37 = vrot.lane.b32.xlu0 %v704_v1, %s799_s11  ;;  %106 = vmatprep.subr.bf16.mxu0 %v869_v16 }
   0xe   :  { %v706_v4 = vpop.eup %705  ;;  %184 = vmatprep.subr.bf16.mxu1 %v869_v16 }
   0xf   :  { %v28_v5 = vadd.f32 1.0, %v706_v4 }
  0x10   :  { %107 = vmatpush1.bf16.msra.mxu0 %v874_v18  ;;  %185 = vmatpush1.bf16.msra.mxu1 %v874_v18 }
  0x11   :  { %707 = vrcp.f32 %v28_v5  ;;  %256 = vmatprep.subr.bf16.mxu0 %v827_v9  ;;  %334 = vmatprep.subr.bf16.mxu1 %v827_v9 }
  0x1b   :  { %v708_v6 = vpop.eup %707 }
  0x1c   :  { %v35_v15 = vmul.f32 0.0, %v708_v6 }
  0x7f   :  { %v38_v7 = vpop.permute.xlu0 %37 }
  0x80   :  { %v40_v8 = vmul.f32 %v708_v6, %v38_v7 }
  0x82   :  { %42 = vrot.lane.b32.xlu0 %v40_v8, %s799_s11 }
  0xf4   :  { %v43_v17 = vpop.permute.xlu0 %42 }
  0xf5   :  { %v45_v19 = vadd.f32 %v43_v17, %v35_v15 }
  0xf7   :  { %709 = vtanh.f32 %v45_v19 }
  0xf8   :  { %711 = vpow2.f32 %v645_v22 }
 0x101   :  { %v710_v21 = vpop.eup %709 }
 0x102   :  { %48 = vrot.lane.b32.xlu1 %v710_v21, %s799_s11  ;;  %v712_v23 = vpop.eup %711 }
 0x103   :  { %v29_v24 = vadd.f32 1.0, %v712_v23 }
 0x105   :  { %713 = vrcp.f32 %v29_v24 }
 0x10f   :  { %v714_v25 = vpop.eup %713 }
 0x174   :  { %v49_v26 = vpop.permute.xlu1 %48 }
 0x175   :  { %v51_v27 = vmul.f32 %v714_v25, %v49_v26  ;;  %v665_v26 = vld [vmem:[%s1002_s0 + $0x38] sm:$0xff] }
 0x177   :  { %v55_v28 = vpack.c.bf16 %v51_v27, %v51_v27 }
 0x179   :  { %656 = vmatmul.mubr.msk.bf16.vlgmr.msra.gmra.mrb[0].mxu0 %vm96_vm0, %v55_v28 }
 0x17a   :  { %257 = vmatpush1.bf16.msra.mxu0 %v832_v10  ;;  %288 = vmatprep.mubr.bf16.mxu0 %v800_v20 }
 0x17b   :  { %258 = vmatprep.subr.bf16.mxu0 %v838_v11 }
 0x17e   :  { %259 = vmatpush1.bf16.msra.mxu0 %v845_v12 }
 0x17f   :  { %260 = vmatprep.subr.bf16.mxu0 %v852_v13 }
 0x182   :  { %261 = vmatpush1.bf16.msra.mxu0 %v859_v14 }
 0x183   :  { %262 = vmatprep.subr.bf16.mxu0 %v869_v16 }
 0x186   :  { %263 = vmatpush1.bf16.msra.mxu0 %v874_v18 }
 0x187   :  { %412 = vmatprep.subr.bf16.mxu0 %v827_v9 }
 0x24c   :  { %v134_v30 = vpop.f32.mrb[0].mxu0 }
 0x24d   :  { %v136_v31 = vpop.f32.mrb[1].mxu0  ;;  %v135_v37 = vadd.f32 %v646_v36, %v134_v30 }
 0x24e   :  { %v137_v32 = vadd.f32 %v647_v29, %v136_v31  ;;  %v138_v33 = vpop.f32.mrb[2].mxu0 }
 0x24f   :  { %v139_v34 = vpop.f32.mrb[3].mxu0  ;;  %v657_v38 = vmul.f32 -1.442695, %v135_v37  ;;  %v664_v33 = vld [vmem:[%s1002_s0 + $0x30] sm:$0xff] }
 0x250   :  { %715 = vtanh.f32 %v137_v32  ;;  %v658_v48 = vmul.f32 -1.442695, %v137_v32 }
 0x251   :  { %717 = vpow2.f32 %v657_v38 }
 0x25a   :  { %v716_v35 = vpop.eup %715 }
 0x25b   :  { %156 = vrot.lane.b32.xlu1 %v716_v35, %s799_s11  ;;  %v718_v39 = vpop.eup %717 }
 0x25c   :  { %v147_v40 = vadd.f32 1.0, %v718_v39 }
 0x25e   :  { %719 = vrcp.f32 %v147_v40 }
 0x268   :  { %v720_v41 = vpop.eup %719 }
 0x269   :  { %v154_v44 = vmul.f32 %v720_v41, %v45_v19 }
 0x2cd   :  { %v157_v42 = vpop.permute.xlu1 %156 }
 0x2ce   :  { %v159_v43 = vmul.f32 %v720_v41, %v157_v42 }
 0x2d0   :  { %161 = vrot.lane.b32.xlu0 %v159_v43, %s799_s11 }
 0x342   :  { %v162_v45 = vpop.permute.xlu0 %161 }
 0x343   :  { %v164_v46 = vadd.f32 %v162_v45, %v154_v44 }
 0x345   :  { %721 = vtanh.f32 %v164_v46 }
 0x346   :  { %723 = vpow2.f32 %v658_v48 }
 0x34f   :  { %v722_v47 = vpop.eup %721 }
 0x350   :  { %167 = vrot.lane.b32.xlu1 %v722_v47, %s799_s11  ;;  %v724_v49 = vpop.eup %723 }
 0x351   :  { %v148_v50 = vadd.f32 1.0, %v724_v49 }
 0x353   :  { %725 = vrcp.f32 %v148_v50 }
 0x35d   :  { %v726_v51 = vpop.eup %725 }
 0x3c2   :  { %v168_v52 = vpop.permute.xlu1 %167 }
 0x3c3   :  { %v170_v53 = vmul.f32 %v726_v51, %v168_v52  ;;  %v670_v51 = vld [vmem:[%s1002_s0 + $0x48] sm:$0xff] }
 0x3c5   :  { %v174_v54 = vpack.c.bf16 %v170_v53, %v170_v53 }
 0x3c7   :  { %661 = vmatmul.mubr.msk.bf16.vlgmr.msra.gmra.mrb[0].mxu1 %vm96_vm0, %v174_v54 }
 0x3c8   :  { %335 = vmatpush1.bf16.msra.mxu1 %v832_v10  ;;  %366 = vmatprep.mubr.bf16.mxu1 %v800_v20 }
 0x3c9   :  { %336 = vmatprep.subr.bf16.mxu1 %v838_v11 }
 0x3cc   :  { %337 = vmatpush1.bf16.msra.mxu1 %v845_v12 }
 0x3cd   :  { %338 = vmatprep.subr.bf16.mxu1 %v852_v13 }
 0x3d0   :  { %339 = vmatpush1.bf16.msra.mxu1 %v859_v14 }
 0x3d1   :  { %340 = vmatprep.subr.bf16.mxu1 %v869_v16 }
 0x3d4   :  { %341 = vmatpush1.bf16.msra.mxu1 %v874_v18 }
 0x3d5   :  { %490 = vmatprep.subr.bf16.mxu1 %v827_v9 }
 0x49a   :  { %v212_v56 = vpop.f32.mrb[0].mxu1 }
 0x49b   :  { %v214_v57 = vpop.f32.mrb[1].mxu1  ;;  %v213_v63 = vadd.f32 %v659_v62, %v212_v56 }
 0x49c   :  { %v215_v58 = vadd.f32 %v660_v55, %v214_v57  ;;  %v216_v59 = vpop.f32.mrb[2].mxu1 }
 0x49d   :  { %v217_v60 = vpop.f32.mrb[3].mxu1  ;;  %v662_v0 = vmul.f32 -1.442695, %v213_v63 }
 0x49e   :  { %727 = vtanh.f32 %v215_v58  ;;  %v663_v17 = vmul.f32 -1.442695, %v215_v58  ;;  %v669_v58 = vld [vmem:[%s1002_s0 + $0x40] sm:$0xff] }
 0x49f   :  { %729 = vpow2.f32 %v662_v0 }
 0x4a8   :  { %v728_v61 = vpop.eup %727 }
 0x4a9   :  { %234 = vrot.lane.b32.xlu0 %v728_v61, %s799_s11  ;;  %v730_v1 = vpop.eup %729 }
 0x4aa   :  { %v225_v2 = vadd.f32 1.0, %v730_v1 }
 0x4ac   :  { %731 = vrcp.f32 %v225_v2 }
 0x4b6   :  { %v732_v3 = vpop.eup %731 }
 0x4b7   :  { %v232_v6 = vmul.f32 %v732_v3, %v164_v46 }
 0x51b   :  { %v235_v4 = vpop.permute.xlu0 %234 }
 0x51c   :  { %v237_v5 = vmul.f32 %v732_v3, %v235_v4 }
 0x51e   :  { %239 = vrot.lane.b32.xlu1 %v237_v5, %s799_s11 }
 0x590   :  { %v240_v7 = vpop.permute.xlu1 %239 }
 0x591   :  { %v242_v8 = vadd.f32 %v240_v7, %v232_v6 }
 0x593   :  { %733 = vtanh.f32 %v242_v8 }
 0x594   :  { %735 = vpow2.f32 %v663_v17 }
 0x59d   :  { %v734_v15 = vpop.eup %733 }
 0x59e   :  { %245 = vrot.lane.b32.xlu0 %v734_v15, %s799_s11  ;;  %v736_v19 = vpop.eup %735 }
 0x59f   :  { %v226_v21 = vadd.f32 1.0, %v736_v19 }
 0x5a1   :  { %737 = vrcp.f32 %v226_v21 }
 0x5ab   :  { %v738_v22 = vpop.eup %737 }
 0x610   :  { %v246_v23 = vpop.permute.xlu0 %245 }
 0x611   :  { %v248_v24 = vmul.f32 %v738_v22, %v246_v23  ;;  %v675_v22 = vld [vmem:[%s1002_s0 + $0x58] sm:$0xff] }
 0x613   :  { %v252_v25 = vpack.c.bf16 %v248_v24, %v248_v24 }
 0x615   :  { %666 = vmatmul.mubr.msk.bf16.vlgmr.msra.gmra.mrb[4].mxu0 %vm96_vm0, %v252_v25 }
 0x616   :  { %413 = vmatpush1.bf16.msra.mxu0 %v832_v10  ;;  %444 = vmatprep.mubr.bf16.mxu0 %v800_v20 }
 0x617   :  { %414 = vmatprep.subr.bf16.mxu0 %v838_v11 }
 0x61a   :  { %415 = vmatpush1.bf16.msra.mxu0 %v845_v12 }
 0x61b   :  { %416 = vmatprep.subr.bf16.mxu0 %v852_v13 }
 0x61e   :  { %417 = vmatpush1.bf16.msra.mxu0 %v859_v14 }
 0x61f   :  { %418 = vmatprep.subr.bf16.mxu0 %v869_v16 }
 0x622   :  { %419 = vmatpush1.bf16.msra.mxu0 %v874_v18 }
 0x623   :  { %568 = vmatprep.subr.bf16.mxu0 %v827_v9 }
 0x6e8   :  { %v290_v27 = vpop.f32.mrb[4].mxu0 }
 0x6e9   :  { %v292_v28 = vpop.f32.mrb[5].mxu0  ;;  %v291_v34 = vadd.f32 %v664_v33, %v290_v27 }
 0x6ea   :  { %v293_v29 = vadd.f32 %v665_v26, %v292_v28  ;;  %v294_v30 = vpop.f32.mrb[6].mxu0 }
 0x6eb   :  { %v295_v31 = vpop.f32.mrb[7].mxu0  ;;  %v667_v35 = vmul.f32 -1.442695, %v291_v34 }
 0x6ec   :  { %739 = vtanh.f32 %v293_v29  ;;  %v668_v44 = vmul.f32 -1.442695, %v293_v29 }
 0x6ed   :  { %741 = vpow2.f32 %v667_v35 }
 0x6f6   :  { %v740_v32 = vpop.eup %739 }
 0x6f7   :  { %312 = vrot.lane.b32.xlu1 %v740_v32, %s799_s11  ;;  %v742_v9 = vpop.eup %741 }
 0x6f8   :  { %v303_v36 = vadd.f32 1.0, %v742_v9 }
 0x6fa   :  { %743 = vrcp.f32 %v303_v36 }
 0x704   :  { %v744_v37 = vpop.eup %743 }
 0x705   :  { %v310_v40 = vmul.f32 %v744_v37, %v242_v8 }
 0x769   :  { %v313_v38 = vpop.permute.xlu1 %312 }
 0x76a   :  { %v315_v39 = vmul.f32 %v744_v37, %v313_v38 }
 0x76c   :  { %317 = vrot.lane.b32.xlu0 %v315_v39, %s799_s11  ;;  %v680_v39 = vld [vmem:[%s1002_s0 + $0x68] sm:$0xff] }
 0x7de   :  { %v318_v41 = vpop.permute.xlu0 %317 }
 0x7df   :  { %v320_v42 = vadd.f32 %v318_v41, %v310_v40 }
 0x7e1   :  { %745 = vtanh.f32 %v320_v42 }
 0x7e2   :  { %747 = vpow2.f32 %v668_v44 }
 0x7eb   :  { %v746_v43 = vpop.eup %745 }
 0x7ec   :  { %323 = vrot.lane.b32.xlu1 %v746_v43, %s799_s11  ;;  %v748_v45 = vpop.eup %747 }
 0x7ed   :  { %v304_v46 = vadd.f32 1.0, %v748_v45 }
 0x7ef   :  { %749 = vrcp.f32 %v304_v46  ;;  %v679_v46 = vld [vmem:[%s1002_s0 + $0x60] sm:$0xff] }
 0x7f9   :  { %v750_v47 = vpop.eup %749 }
 0x85e   :  { %v324_v48 = vpop.permute.xlu1 %323 }
 0x85f   :  { %v326_v49 = vmul.f32 %v750_v47, %v324_v48 }
 0x861   :  { %v330_v50 = vpack.c.bf16 %v326_v49, %v326_v49 }
 0x863   :  { %671 = vmatmul.mubr.msk.bf16.vlgmr.msra.gmra.mrb[4].mxu1 %vm96_vm0, %v330_v50 }
 0x864   :  { %491 = vmatpush1.bf16.msra.mxu1 %v832_v10  ;;  %522 = vmatprep.mubr.bf16.mxu1 %v800_v20 }
 0x865   :  { %492 = vmatprep.subr.bf16.mxu1 %v838_v11 }
 0x868   :  { %493 = vmatpush1.bf16.msra.mxu1 %v845_v12 }
 0x869   :  { %494 = vmatprep.subr.bf16.mxu1 %v852_v13 }
 0x86c   :  { %495 = vmatpush1.bf16.msra.mxu1 %v859_v14 }
 0x86d   :  { %496 = vmatprep.subr.bf16.mxu1 %v869_v16 }
 0x870   :  { %497 = vmatpush1.bf16.msra.mxu1 %v874_v18 }
 0x936   :  { %v368_v52 = vpop.f32.mrb[4].mxu1 }
 0x937   :  { %v370_v53 = vpop.f32.mrb[5].mxu1  ;;  %v369_v59 = vadd.f32 %v669_v58, %v368_v52 }
 0x938   :  { %v371_v54 = vadd.f32 %v670_v51, %v370_v53  ;;  %v372_v55 = vpop.f32.mrb[6].mxu1 }
 0x939   :  { %v373_v56 = vpop.f32.mrb[7].mxu1  ;;  %v672_v60 = vmul.f32 -1.442695, %v369_v59 }
 0x93a   :  { %751 = vtanh.f32 %v371_v54  ;;  %v673_v6 = vmul.f32 -1.442695, %v371_v54 }
 0x93b   :  { %753 = vpow2.f32 %v672_v60 }
 0x944   :  { %v752_v57 = vpop.eup %751 }
 0x945   :  { %390 = vrot.lane.b32.xlu0 %v752_v57, %s799_s11  ;;  %v754_v61 = vpop.eup %753 }
 0x946   :  { %v381_v62 = vadd.f32 1.0, %v754_v61 }
 0x948   :  { %755 = vrcp.f32 %v381_v62 }
 0x952   :  { %v756_v63 = vpop.eup %755 }
 0x953   :  { %v388_v2 = vmul.f32 %v756_v63, %v320_v42 }
 0x9b7   :  { %v391_v0 = vpop.permute.xlu0 %390 }
 0x9b8   :  { %v393_v1 = vmul.f32 %v756_v63, %v391_v0 }
 0x9ba   :  { %395 = vrot.lane.b32.xlu1 %v393_v1, %s799_s11  ;;  %v685_v1 = vld [vmem:[%s1002_s0 + $0x78] sm:$0xff] }
 0xa2c   :  { %v396_v3 = vpop.permute.xlu1 %395 }
 0xa2d   :  { %v398_v4 = vadd.f32 %v396_v3, %v388_v2 }
 0xa2f   :  { %757 = vtanh.f32 %v398_v4 }
 0xa30   :  { %759 = vpow2.f32 %v673_v6 }
 0xa39   :  { %v758_v5 = vpop.eup %757 }
 0xa3a   :  { %401 = vrot.lane.b32.xlu0 %v758_v5, %s799_s11  ;;  %v760_v7 = vpop.eup %759 }
 0xa3b   :  { %v382_v8 = vadd.f32 1.0, %v760_v7 }
 0xa3d   :  { %761 = vrcp.f32 %v382_v8  ;;  %v684_v8 = vld [vmem:[%s1002_s0 + $0x70] sm:$0xff] }
 0xa47   :  { %v762_v15 = vpop.eup %761 }
 0xaac   :  { %v402_v17 = vpop.permute.xlu0 %401 }
 0xaad   :  { %v404_v19 = vmul.f32 %v762_v15, %v402_v17 }
 0xaaf   :  { %v408_v21 = vpack.c.bf16 %v404_v19, %v404_v19 }
 0xab1   :  { %676 = vmatmul.mubr.msk.bf16.vlgmr.msra.gmra.mrb[8].mxu0 %vm96_vm0, %v408_v21 }
 0xab2   :  { %569 = vmatpush1.bf16.msra.mxu0 %v832_v10  ;;  %600 = vmatprep.mubr.bf16.mxu0 %v800_v20 }
 0xab3   :  { %570 = vmatprep.subr.bf16.mxu0 %v838_v11 }
 0xab6   :  { %571 = vmatpush1.bf16.msra.mxu0 %v845_v12  ;;  %v674_v12 = vld [vmem:[%s1002_s0 + $0x50] sm:$0xff] }
 0xab7   :  { %572 = vmatprep.subr.bf16.mxu0 %v852_v13 }
 0xaba   :  { %573 = vmatpush1.bf16.msra.mxu0 %v859_v14 }
 0xabb   :  { %574 = vmatprep.subr.bf16.mxu0 %v869_v16 }
 0xabe   :  { %575 = vmatpush1.bf16.msra.mxu0 %v874_v18 }
 0xb84   :  { %v446_v23 = vpop.f32.mrb[8].mxu0 }
 0xb85   :  { %v448_v10 = vpop.f32.mrb[9].mxu0  ;;  %v447_v13 = vadd.f32 %v674_v12, %v446_v23 }
 0xb86   :  { %v449_v24 = vadd.f32 %v675_v22, %v448_v10  ;;  %v450_v20 = vpop.f32.mrb[10].mxu0 }
 0xb87   :  { %v451_v25 = vpop.f32.mrb[11].mxu0  ;;  %v677_v14 = vmul.f32 -1.442695, %v447_v13 }
 0xb88   :  { %763 = vtanh.f32 %v449_v24  ;;  %v678_v33 = vmul.f32 -1.442695, %v449_v24 }
 0xb89   :  { %765 = vpow2.f32 %v677_v14 }
 0xb92   :  { %v764_v11 = vpop.eup %763 }
 0xb93   :  { %468 = vrot.lane.b32.xlu1 %v764_v11, %s799_s11  ;;  %v766_v16 = vpop.eup %765 }
 0xb94   :  { %v459_v18 = vadd.f32 1.0, %v766_v16 }
 0xb96   :  { %767 = vrcp.f32 %v459_v18 }
 0xba0   :  { %v768_v26 = vpop.eup %767 }
 0xba1   :  { %v466_v29 = vmul.f32 %v768_v26, %v398_v4 }
 0xc05   :  { %v469_v27 = vpop.permute.xlu1 %468 }
 0xc06   :  { %v471_v28 = vmul.f32 %v768_v26, %v469_v27 }
 0xc08   :  { %473 = vrot.lane.b32.xlu0 %v471_v28, %s799_s11 }
 0xc7a   :  { %v474_v30 = vpop.permute.xlu0 %473 }
 0xc7b   :  { %v476_v31 = vadd.f32 %v474_v30, %v466_v29 }
 0xc7d   :  { %769 = vtanh.f32 %v476_v31 }
 0xc7e   :  { %771 = vpow2.f32 %v678_v33 }
 0xc87   :  { %v770_v32 = vpop.eup %769 }
 0xc88   :  { %479 = vrot.lane.b32.xlu1 %v770_v32, %s799_s11  ;;  %v772_v34 = vpop.eup %771 }
 0xc89   :  { %v460_v35 = vadd.f32 1.0, %v772_v34 }
 0xc8b   :  { %773 = vrcp.f32 %v460_v35 }
 0xc95   :  { %v774_v9 = vpop.eup %773 }
 0xcfa   :  { %v480_v36 = vpop.permute.xlu1 %479 }
 0xcfb   :  { %v482_v37 = vmul.f32 %v774_v9, %v480_v36 }
 0xcfd   :  { %v486_v38 = vpack.c.bf16 %v482_v37, %v482_v37 }
 0xcff   :  { %681 = vmatmul.mubr.msk.bf16.vlgmr.msra.gmra.mrb[8].mxu1 %vm96_vm0, %v486_v38 }
 0xdd2   :  { %v524_v40 = vpop.f32.mrb[8].mxu1 }
 0xdd3   :  { %v526_v41 = vpop.f32.mrb[9].mxu1  ;;  %v525_v47 = vadd.f32 %v679_v46, %v524_v40 }
 0xdd4   :  { %v527_v42 = vadd.f32 %v680_v39, %v526_v41  ;;  %v528_v43 = vpop.f32.mrb[10].mxu1 }
 0xdd5   :  { %v529_v44 = vpop.f32.mrb[11].mxu1  ;;  %v682_v48 = vmul.f32 -1.442695, %v525_v47 }
 0xdd6   :  { %775 = vtanh.f32 %v527_v42  ;;  %v683_v58 = vmul.f32 -1.442695, %v527_v42 }
 0xdd7   :  { %777 = vpow2.f32 %v682_v48 }
 0xde0   :  { %v776_v45 = vpop.eup %775 }
 0xde1   :  { %546 = vrot.lane.b32.xlu0 %v776_v45, %s799_s11  ;;  %v778_v49 = vpop.eup %777 }
 0xde2   :  { %v537_v50 = vadd.f32 1.0, %v778_v49 }
 0xde4   :  { %779 = vrcp.f32 %v537_v50 }
 0xdee   :  { %v780_v51 = vpop.eup %779 }
 0xdef   :  { %v544_v54 = vmul.f32 %v780_v51, %v476_v31 }
 0xe53   :  { %v547_v52 = vpop.permute.xlu0 %546 }
 0xe54   :  { %v549_v53 = vmul.f32 %v780_v51, %v547_v52 }
 0xe56   :  { %551 = vrot.lane.b32.xlu1 %v549_v53, %s799_s11 }
 0xec8   :  { %v552_v55 = vpop.permute.xlu1 %551 }
 0xec9   :  { %v554_v56 = vadd.f32 %v552_v55, %v544_v54 }
 0xecb   :  { %781 = vtanh.f32 %v554_v56 }
 0xecc   :  { %783 = vpow2.f32 %v683_v58 }
 0xed5   :  { %v782_v57 = vpop.eup %781 }
 0xed6   :  { %557 = vrot.lane.b32.xlu0 %v782_v57, %s799_s11  ;;  %v784_v59 = vpop.eup %783 }
 0xed7   :  { %v538_v60 = vadd.f32 1.0, %v784_v59 }
 0xed9   :  { %785 = vrcp.f32 %v538_v60 }
 0xee3   :  { %v786_v61 = vpop.eup %785 }
 0xf48   :  { %v558_v62 = vpop.permute.xlu0 %557 }
 0xf49   :  { %v560_v63 = vmul.f32 %v786_v61, %v558_v62 }
 0xf4b   :  { %v564_v0 = vpack.c.bf16 %v560_v63, %v560_v63 }
 0xf4d   :  { %686 = vmatmul.mubr.msk.bf16.vlgmr.msra.gmra.mrb[12].mxu0 %vm96_vm0, %v564_v0 }
0x1020   :  { %v602_v2 = vpop.f32.mrb[12].mxu0 }
0x1021   :  { %v604_v3 = vpop.f32.mrb[13].mxu0  ;;  %v603_v15 = vadd.f32 %v684_v8, %v602_v2 }
0x1022   :  { %v605_v4 = vadd.f32 %v685_v1, %v604_v3  ;;  %v606_v5 = vpop.f32.mrb[14].mxu0 }
0x1023   :  { %v607_v6 = vpop.f32.mrb[15].mxu0  ;;  %v687_v17 = vmul.f32 -1.442695, %v603_v15 }
0x1024   :  { %787 = vtanh.f32 %v605_v4  ;;  %v688_v12 = vmul.f32 -1.442695, %v605_v4 }
0x1025   :  { %789 = vpow2.f32 %v687_v17 }
0x102e   :  { %v788_v7 = vpop.eup %787 }
0x102f   :  { %624 = vrot.lane.b32.xlu1 %v788_v7, %s799_s11  ;;  %v790_v19 = vpop.eup %789 }
0x1030   :  { %v615_v21 = vadd.f32 1.0, %v790_v19 }
0x1032   :  { %791 = vrcp.f32 %v615_v21 }
0x103c   :  { %v792_v22 = vpop.eup %791 }
0x103d   :  { %v622_v24 = vmul.f32 %v792_v22, %v554_v56 }
0x10a1   :  { %v625_v23 = vpop.permute.xlu1 %624 }
0x10a2   :  { %v627_v10 = vmul.f32 %v792_v22, %v625_v23 }
0x10a4   :  { %629 = vrot.lane.b32.xlu0 %v627_v10, %s799_s11 }
0x1116   :  { %v630_v20 = vpop.permute.xlu0 %629 }
0x1117   :  { %v632_v25 = vadd.f32 %v630_v20, %v622_v24 }
0x1119   :  { %793 = vtanh.f32 %v632_v25 }
0x111a   :  { %795 = vpow2.f32 %v688_v12 }
0x1123   :  { %v794_v11 = vpop.eup %793 }
0x1124   :  { %635 = vrot.lane.b32.xlu1 %v794_v11, %s799_s11  ;;  %v796_v13 = vpop.eup %795 }
0x1125   :  { %v616_v14 = vadd.f32 1.0, %v796_v13 }
0x1127   :  { %797 = vrcp.f32 %v616_v14 }
0x1131   :  { %v798_v16 = vpop.eup %797 }
0x1196   :  { %v636_v18 = vpop.permute.xlu1 %635 }
0x1197   :  { %v638_v26 = vmul.f32 %v798_v16, %v636_v18 }
0x1199   :  { %639 = vst.msk [vmem:[%s1004_s2] sm:$0xff] %vm96_vm0, %v638_v26 }

</bundles_post_ra>
